<compile_context>
chip_gen: v6e
topology: v6e:2x2x1
jax: 0.10.0
libtpu: 0.0.40
codegen_flags: <defaults>
</compile_context>

<pallas_src>
import jax
import jax.numpy as jnp
from jax import lax
from jax.experimental import pallas as pl
from jax.experimental.pallas import tpu as pltpu


def _round_up(v, m):
    return ((v + m - 1) // m) * m


def _pad_axis(a, axis, size):
    pads = [(0, 0)] * a.ndim
    pads[axis] = (0, size - a.shape[axis])
    return jnp.pad(a, pads)


def prepare_params(p, input_dim, seq_len=48):
    """One-time (offline) composition of conv1..conv4 + fc1 into a single f32 affine
    map from the flattened input (Cin*seq_len) to the hidden width, then padding to
    lane multiples and casting the two MXU operands to bf16."""
    F = input_dim * seq_len

    def conv1d(x, w, b, stride):
        y = lax.conv_general_dilated(
            x, w, window_strides=(stride,), padding="VALID",
            dimension_numbers=("NCH", "OIH", "NCH"))
        return y + b[None, :, None]

    def chain_to_fc1(x):                       # (B, Cin, L) -> (B, hidden), no ReLU
        h = conv1d(x, p["conv1_w"], p["conv1_b"], 4)
        h = conv1d(h, p["conv2_w"], p["conv2_b"], 3)
        h = conv1d(h, p["conv3_w"], p["conv3_b"], 1)
        h = conv1d(h, p["conv4_w"], p["conv4_b"], 1)
        h = h.reshape(h.shape[0], -1)
        return h @ p["fc1_w"].T + p["fc1_b"]

    # Probe the affine chain with the identity basis of the row-major flattened
    # input:  f(x_flat) = x_flat @ A + c  with  c = f(0),  A[i] = f(e_i) - c.
    basis = jnp.concatenate(
        [jnp.zeros((1, F), jnp.float32), jnp.eye(F, dtype=jnp.float32)], axis=0)
    y = chain_to_fc1(basis.reshape(F + 1, input_dim, seq_len))
    c = y[0]
    A = y[1:] - c[None, :]                     # (F, hidden), exact f32 composition

    hidden = A.shape[1]
    out_dim = p["fc2_w"].shape[0]
    hp = _round_up(hidden, 128)
    op = _round_up(out_dim, 128)

    wa = _pad_axis(A, 1, hp).astype(jnp.bfloat16)                         # (F, hp)
    ba = _pad_axis(c.reshape(1, -1).astype(jnp.float32), 1, hp)           # (1, hp)
    w2 = _pad_axis(_pad_axis(p["fc2_w"].T.astype(jnp.float32), 0, hp),
                   1, op).astype(jnp.bfloat16)                            # (hp, op)
    b2 = _pad_axis(p["fc2_b"].reshape(1, -1).astype(jnp.float32), 1, op)  # (1, op)
    return {"wa": wa, "ba": ba, "w2": w2, "b2": b2}


def conv_net1_forward(x_ncl, kp, out_dim, *, batch_tile=1024):
    """x_ncl: (N, C_in, 48) float32 (PyTorch layout). kp: output of prepare_params."""
    n, cin, L = x_ncl.shape
    F = cin * L
    wa, ba, w2, b2 = kp["wa"], kp["ba"], kp["w2"], kp["b2"]
    assert wa.shape[0] == F, "prepare_params was built for a different (C_in, L)"
    op = w2.shape[1]

    # Batch tile: sublane-aligned, capped at ceil(n/2) so the grid has >= 2 steps
    # whenever there is enough work (lets ("parallel",) use both v7x TensorCores).
    tb = max(8, min(batch_tile, _round_up(pl.cdiv(n, 2), 8)))
    n_pad = _round_up(n, tb)
    grid_b = n_pad // tb

    # Natural row-major flatten of (Cin, L): a free reshape -- no transpose / im2col /
    # cast pass in the wrapper (the bf16 cast happens inside the kernel).
    x = x_ncl.reshape(n, F)
    if n_pad != n:
        x = jnp.pad(x, ((0, n_pad - n), (0, 0)))   # padded rows are masked in-kernel

    def logits_stats_kernel(x_ref, wa_ref, ba_ref, w2_ref, b2_ref,
                            z_ref, tm_ref, ts_ref):
        b = pl.program_id(0)
        # Fused conv1..conv4 + fc1: one MXU matmul (bf16 operands, f32 accumulate).
        h = jnp.dot(x_ref[...].astype(jnp.bfloat16), wa_ref[...],
                    preferred_element_type=jnp.float32) + ba_ref[...]
        h = jnp.maximum(h, 0.0)                                          # ReLU
        z = jnp.dot(h.astype(jnp.bfloat16), w2_ref[...],
                    preferred_element_type=jnp.float32) + b2_ref[...]    # logits
        if n_pad != n:  # mask padded batch rows out of the dim-0 softmax
            row = lax.broadcasted_iota(jnp.int32, z.shape, 0) + b * tb
            z = jnp.where(row < n, z, jnp.float32(-1e30))
        z_ref[...] = z
        # Softmax(dim=0) epilogue: per-tile column max / exp-sum (no extra HBM pass).
        tmax = jnp.max(z, axis=0, keepdims=True)                         # (1, op)
        tsum = jnp.sum(jnp.exp(z - tmax), axis=0, keepdims=True)         # (1, op)
        tm_ref[...] = jnp.broadcast_to(tmax[:, None, :], tm_ref.shape)
        ts_ref[...] = jnp.broadcast_to(tsum[:, None, :], ts_ref.shape)

    logits, tile_max, tile_sum = pl.pallas_call(
        logits_stats_kernel,
        out_shape=(jax.ShapeDtypeStruct((n_pad, op), jnp.float32),
                   jax.ShapeDtypeStruct((grid_b, 8, op), jnp.float32),
                   jax.ShapeDtypeStruct((grid_b, 8, op), jnp.float32)),
        grid=(grid_b,),
        in_specs=[pl.BlockSpec((tb, F), lambda b: (b, 0)),
                  pl.BlockSpec(wa.shape, lambda b: (0, 0)),
                  pl.BlockSpec(ba.shape, lambda b: (0, 0)),
                  pl.BlockSpec(w2.shape, lambda b: (0, 0)),
                  pl.BlockSpec(b2.shape, lambda b: (0, 0))],
        out_specs=(pl.BlockSpec((tb, op), lambda b: (b, 0)),
                   pl.BlockSpec((1, 8, op), lambda b: (b, 0, 0)),
                   pl.BlockSpec((1, 8, op), lambda b: (b, 0, 0))),
        compiler_params=pltpu.CompilerParams(
            dimension_semantics=("parallel",),
            vmem_limit_bytes=32 * 1024 * 1024),
    )(x, wa, ba, w2, b2)

    def normalize_kernel(z_ref, tm_ref, ts_ref, out_ref):
        tm = tm_ref[...][:, 0, :]                                        # (G, op)
        ts = ts_ref[...][:, 0, :]                                        # (G, op)
        m = jnp.max(tm, axis=0, keepdims=True)                           # (1, op)
        s = jnp.sum(ts * jnp.exp(tm - m), axis=0, keepdims=True)         # (1, op)
        out_ref[...] = jnp.exp(z_ref[...] - m) * pl.reciprocal(s, approx=True)

    probs_pad = pl.pallas_call(
        normalize_kernel,
        out_shape=jax.ShapeDtypeStruct((n_pad, op), jnp.float32),
        grid=(grid_b,),
        in_specs=[pl.BlockSpec((tb, op), lambda b: (b, 0)),
                  pl.BlockSpec((grid_b, 8, op), lambda b: (0, 0, 0)),
                  pl.BlockSpec((grid_b, 8, op), lambda b: (0, 0, 0))],
        out_specs=pl.BlockSpec((tb, op), lambda b: (b, 0)),
        input_output_aliases={0: 0},   # probabilities overwrite the logits buffer
        compiler_params=pltpu.CompilerParams(
            dimension_semantics=("parallel",),
            vmem_limit_bytes=32 * 1024 * 1024),
    )(logits, tile_max, tile_sum)

    return probs_pad[:n, :out_dim]


def init_params(key, input_dim, hidden_width, output_dim):
    """Deterministic init with PyTorch-style U(-1/sqrt(fan_in), 1/sqrt(fan_in)) bounds."""
    def uni(k, shape, fan_in):
        bound = 1.0 / (fan_in ** 0.5)
        return jax.random.uniform(k, shape, jnp.float32, -bound, bound)
    ks = jax.random.split(key, 12)
    p = {}
    p["conv1_w"] = uni(ks[0], (56, input_dim, 4), input_dim * 4)
    p["conv1_b"] = uni(ks[1], (56,), input_dim * 4)
    p["conv2_w"] = uni(ks[2], (112, 56, 3), 56 * 3)
    p["conv2_b"] = uni(ks[3], (112,), 56 * 3)
    p["conv3_w"] = uni(ks[4], (224, 112, 3), 112 * 3)
    p["conv3_b"] = uni(ks[5], (224,), 112 * 3)
    p["conv4_w"] = uni(ks[6], (224, 224, 2), 224 * 2)
    p["conv4_b"] = uni(ks[7], (224,), 224 * 2)
    p["fc1_w"] = uni(ks[8], (hidden_width, 224), 224)
    p["fc1_b"] = uni(ks[9], (hidden_width,), 224)
    p["fc2_w"] = uni(ks[10], (output_dim, hidden_width), hidden_width)
    p["fc2_b"] = uni(ks[11], (output_dim,), hidden_width)
    return p


def reference_forward(x_ncl, p):
    """Plain-JAX f32 reference matching the PyTorch forward exactly."""
    def conv1d(x, w, b, stride):
        y = lax.conv_general_dilated(
            x, w, window_strides=(stride,), padding="VALID",
            dimension_numbers=("NCH", "OIH", "NCH"))
        return y + b[None, :, None]
    h = conv1d(x_ncl, p["conv1_w"], p["conv1_b"], 4)
    h = conv1d(h, p["conv2_w"], p["conv2_b"], 3)
    h = conv1d(h, p["conv3_w"], p["conv3_b"], 1)
    h = conv1d(h, p["conv4_w"], p["conv4_b"], 1)
    h = h.reshape(h.shape[0], -1)
    h = jnp.maximum(h @ p["fc1_w"].T + p["fc1_b"], 0.0)
    logits = h @ p["fc2_w"].T + p["fc2_b"]
    return jax.nn.softmax(logits, axis=0)


if __name__ == "__main__":
    # Small shapes consistent with the module: fc1 expects 224 features, so the
    # spatial length after conv4 must be exactly 1  ->  input length L = 48.
    N, INPUT_DIM, L = 2, 4, 48
    HIDDEN_WIDTH, OUTPUT_DIM = 32, 8

    key = jax.random.PRNGKey(0)
    kx, kparam = jax.random.split(key)
    x = jax.random.normal(kx, (N, INPUT_DIM, L), dtype=jnp.float32)
    params = init_params(kparam, INPUT_DIM, HIDDEN_WIDTH, OUTPUT_DIM)

    # One-time f32 composition of the whole conv1..conv4+fc1 chain (hoisted out of
    # the forward path).
    kernel_params = prepare_params(params, INPUT_DIM, L)

    fwd = jax.jit(conv_net1_forward, static_argnames=("out_dim", "batch_tile"))
    out = jax.block_until_ready(fwd(x, kernel_params, out_dim=OUTPUT_DIM))

    ref = jax.block_until_ready(reference_forward(x, params))
    assert out.shape == (N, OUTPUT_DIM)
    # Only two bf16 matmuls (weights composed in f32) -> tighter tolerance than before.
    assert jnp.allclose(out, ref, atol=1e-2, rtol=1e-2), "mismatch vs plain-JAX reference"

    print("KERNEL_OK")
</pallas_src>

<mosaic_0001>
module attributes {stable_mosaic.version = 11 : i64} {
  func.func @normalize_kernel(%arg0: i32, %arg1: memref<8x128xf32, #tpu.memory_space<vmem>>, %arg2: memref<1x8x128xf32, #tpu.memory_space<vmem>>, %arg3: memref<1x8x128xf32, #tpu.memory_space<vmem>>, %arg4: memref<8x128xf32, #tpu.memory_space<vmem>>) attributes {dimension_semantics = [#tpu.dimension_semantics<parallel>], iteration_bounds = array<i64: 1>, scalar_prefetch = 0 : i64, scratch_operands = 0 : i64, tpu.core_type = #tpu.core_type<tc>, window_params = [{transform_indices = @transform_0, window_bounds = array<i64: 8, 128>}, {pipeline_mode = #tpu.pipeline_mode<synchronous>, transform_indices = @transform_1, window_bounds = array<i64: 1, 8, 128>}, {pipeline_mode = #tpu.pipeline_mode<synchronous>, transform_indices = @transform_2, window_bounds = array<i64: 1, 8, 128>}, {transform_indices = @transform_3, window_bounds = array<i64: 8, 128>}]} {
    %c0 = arith.constant 0 : index
    %c0_0 = arith.constant 0 : index
    %c0_1 = arith.constant 0 : index
    %0 = vector.load %arg2[%c0, %c0_0, %c0_1] : memref<1x8x128xf32, #tpu.memory_space<vmem>>, vector<1x8x128xf32>
    %1 = vector.extract_strided_slice %0 {offsets = [0, 0, 0], sizes = [1, 1, 128], strides = [1, 1, 1]} : vector<1x8x128xf32> to vector<1x1x128xf32>
    %2 = vector.shape_cast %1 : vector<1x1x128xf32> to vector<1x128xf32>
    %c0_2 = arith.constant 0 : index
    %c0_3 = arith.constant 0 : index
    %c0_4 = arith.constant 0 : index
    %3 = vector.load %arg3[%c0_2, %c0_3, %c0_4] : memref<1x8x128xf32, #tpu.memory_space<vmem>>, vector<1x8x128xf32>
    %4 = vector.extract_strided_slice %3 {offsets = [0, 0, 0], sizes = [1, 1, 128], strides = [1, 1, 1]} : vector<1x8x128xf32> to vector<1x1x128xf32>
    %5 = vector.shape_cast %4 : vector<1x1x128xf32> to vector<1x128xf32>
    %cst = arith.constant dense<0xFF800000> : vector<128xf32>
    %6 = vector.multi_reduction <maximumf>, %2, %cst [0] : vector<1x128xf32> to vector<128xf32>
    %7 = vector.shape_cast %6 : vector<128xf32> to vector<1x128xf32>
    %8 = arith.subf %2, %7 : vector<1x128xf32>
    %9 = math.exp %8 : vector<1x128xf32>
    %10 = arith.mulf %5, %9 : vector<1x128xf32>
    %cst_5 = arith.constant dense<0.000000e+00> : vector<128xf32>
    %11 = vector.multi_reduction <add>, %10, %cst_5 [0] : vector<1x128xf32> to vector<128xf32>
    %12 = vector.shape_cast %11 : vector<128xf32> to vector<1x128xf32>
    %c0_6 = arith.constant 0 : index
    %c0_7 = arith.constant 0 : index
    %13 = vector.load %arg1[%c0_6, %c0_7] : memref<8x128xf32, #tpu.memory_space<vmem>>, vector<8x128xf32>
    %14 = vector.broadcast %7 : vector<1x128xf32> to vector<8x128xf32>
    %15 = arith.subf %13, %14 : vector<8x128xf32>
    %16 = math.exp %15 : vector<8x128xf32>
    %17 = tpu.reciprocal %12 {approx = true} : vector<1x128xf32> -> vector<1x128xf32>
    %18 = vector.broadcast %17 : vector<1x128xf32> to vector<8x128xf32>
    %19 = arith.mulf %16, %18 : vector<8x128xf32>
    %c0_8 = arith.constant 0 : index
    %c0_9 = arith.constant 0 : index
    %20 = vector.load %arg4[%c0_8, %c0_9] : memref<8x128xf32, #tpu.memory_space<vmem>>, vector<8x128xf32>
    tpu.vector_store %arg4[%c0_8, %c0_9], %19 {strides = array<i32>} : memref<8x128xf32, #tpu.memory_space<vmem>>, vector<8x128xf32>,
    return
  }
  func.func @transform_0(%arg0: i32) -> (i32, i32) {
    %c0_i32 = arith.constant 0 : i32
    %c0_i32_0 = arith.constant 0 : i32
    return %arg0, %c0_i32 : i32, i32
  }
  func.func @transform_1(%arg0: i32) -> (i32, i32, i32) {
    %c0_i32 = arith.constant 0 : i32
    %c0_i32_0 = arith.constant 0 : i32
    %c0_i32_1 = arith.constant 0 : i32
    %c0_i32_2 = arith.constant 0 : i32
    return %c0_i32, %c0_i32_0, %c0_i32_1 : i32, i32, i32
  }
  func.func @transform_2(%arg0: i32) -> (i32, i32, i32) {
    %c0_i32 = arith.constant 0 : i32
    %c0_i32_0 = arith.constant 0 : i32
    %c0_i32_1 = arith.constant 0 : i32
    %c0_i32_2 = arith.constant 0 : i32
    return %c0_i32, %c0_i32_0, %c0_i32_1 : i32, i32, i32
  }
  func.func @transform_3(%arg0: i32) -> (i32, i32) {
    %c0_i32 = arith.constant 0 : i32
    %c0_i32_0 = arith.constant 0 : i32
    return %arg0, %c0_i32 : i32, i32
  }
}

module attributes {stable_mosaic.version = 11 : i64} {
  func.func @logits_stats_kernel(%arg0: i32, %arg1: memref<8x192xf32, #tpu.memory_space<vmem>>, %arg2: memref<192x128xbf16, #tpu.memory_space<vmem>>, %arg3: memref<1x128xf32, #tpu.memory_space<vmem>>, %arg4: memref<128x128xbf16, #tpu.memory_space<vmem>>, %arg5: memref<1x128xf32, #tpu.memory_space<vmem>>, %arg6: memref<8x128xf32, #tpu.memory_space<vmem>>, %arg7: memref<1x8x128xf32, #tpu.memory_space<vmem>>, %arg8: memref<1x8x128xf32, #tpu.memory_space<vmem>>) attributes {dimension_semantics = [#tpu.dimension_semantics<parallel>], iteration_bounds = array<i64: 1>, scalar_prefetch = 0 : i64, scratch_operands = 0 : i64, tpu.core_type = #tpu.core_type<tc>, window_params = [{transform_indices = @transform_0, window_bounds = array<i64: 8, 192>}, {pipeline_mode = #tpu.pipeline_mode<synchronous>, transform_indices = @transform_1, window_bounds = array<i64: 192, 128>}, {pipeline_mode = #tpu.pipeline_mode<synchronous>, transform_indices = @transform_2, window_bounds = array<i64: 1, 128>}, {pipeline_mode = #tpu.pipeline_mode<synchronous>, transform_indices = @transform_3, window_bounds = array<i64: 128, 128>}, {pipeline_mode = #tpu.pipeline_mode<synchronous>, transform_indices = @transform_4, window_bounds = array<i64: 1, 128>}, {transform_indices = @transform_5, window_bounds = array<i64: 8, 128>}, {transform_indices = @transform_6, window_bounds = array<i64: 1, 8, 128>}, {transform_indices = @transform_7, window_bounds = array<i64: 1, 8, 128>}]} {
    %c0 = arith.constant 0 : index
    %c0_0 = arith.constant 0 : index
    %0 = vector.load %arg1[%c0, %c0_0] : memref<8x192xf32, #tpu.memory_space<vmem>>, vector<8x192xf32>
    %1 = arith.truncf %0 : vector<8x192xf32> to vector<8x192xbf16>
    %c0_1 = arith.constant 0 : index
    %c0_2 = arith.constant 0 : index
    %2 = vector.load %arg2[%c0_1, %c0_2] : memref<192x128xbf16, #tpu.memory_space<vmem>>, vector<192x128xbf16>
    %cst = arith.constant dense<0.000000e+00> : vector<8x128xf32>
    %3 = tpu.matmul %1, %2, %cst {dimension_numbers = #tpu.dot_dimension_numbers<[1], [0], [0], [1], [0, 0, 1, 1], [], []>} : vector<8x192xbf16>, vector<192x128xbf16>, vector<8x128xf32> -> vector<8x128xf32>
    %c0_3 = arith.constant 0 : index
    %c0_4 = arith.constant 0 : index
    %4 = vector.load %arg3[%c0_3, %c0_4] : memref<1x128xf32, #tpu.memory_space<vmem>>, vector<1x128xf32>
    %5 = vector.broadcast %4 : vector<1x128xf32> to vector<8x128xf32>
    %6 = arith.addf %3, %5 : vector<8x128xf32>
    %cst_5 = arith.constant 0.000000e+00 : f32
    %7 = vector.broadcast %cst_5 : f32 to vector<8x128xf32>
    %8 = arith.maximumf %6, %7 : vector<8x128xf32>
    %9 = arith.truncf %8 : vector<8x128xf32> to vector<8x128xbf16>
    %c0_6 = arith.constant 0 : index
    %c0_7 = arith.constant 0 : index
    %10 = vector.load %arg4[%c0_6, %c0_7] : memref<128x128xbf16, #tpu.memory_space<vmem>>, vector<128x128xbf16>
    %cst_8 = arith.constant dense<0.000000e+00> : vector<8x128xf32>
    %11 = tpu.matmul %9, %10, %cst_8 {dimension_numbers = #tpu.dot_dimension_numbers<[1], [0], [0], [1], [0, 0, 1, 1], [], []>} : vector<8x128xbf16>, vector<128x128xbf16>, vector<8x128xf32> -> vector<8x128xf32>
    %c0_9 = arith.constant 0 : index
    %c0_10 = arith.constant 0 : index
    %12 = vector.load %arg5[%c0_9, %c0_10] : memref<1x128xf32, #tpu.memory_space<vmem>>, vector<1x128xf32>
    %13 = vector.broadcast %12 : vector<1x128xf32> to vector<8x128xf32>
    %14 = arith.addf %11, %13 : vector<8x128xf32>
    %15 = tpu.iota {dimensions = array<i32: 0>} : vector<8x128xi32>
    %c8_i32 = arith.constant 8 : i32
    %16 = arith.muli %arg0, %c8_i32 : i32
    %17 = vector.broadcast %16 : i32 to vector<8x128xi32>
    %18 = arith.addi %15, %17 : vector<8x128xi32>
    %c2_i32 = arith.constant 2 : i32
    %19 = vector.broadcast %c2_i32 : i32 to vector<8x128xi32>
    %20 = arith.cmpi slt, %18, %19 : vector<8x128xi32>
    %cst_11 = arith.constant -1.000000e+30 : f32
    %21 = vector.broadcast %cst_11 : f32 to vector<8x128xf32>
    %22 = arith.select %20, %14, %21 : vector<8x128xi1>, vector<8x128xf32>
    %c0_12 = arith.constant 0 : index
    %c0_13 = arith.constant 0 : index
    %23 = vector.load %arg6[%c0_12, %c0_13] : memref<8x128xf32, #tpu.memory_space<vmem>>, vector<8x128xf32>
    tpu.vector_store %arg6[%c0_12, %c0_13], %22 {strides = array<i32>} : memref<8x128xf32, #tpu.memory_space<vmem>>, vector<8x128xf32>,
    %cst_14 = arith.constant dense<0xFF800000> : vector<128xf32>
    %24 = vector.multi_reduction <maximumf>, %22, %cst_14 [0] : vector<8x128xf32> to vector<128xf32>
    %25 = vector.shape_cast %24 : vector<128xf32> to vector<1x128xf32>
    %26 = vector.broadcast %25 : vector<1x128xf32> to vector<8x128xf32>
    %27 = arith.subf %22, %26 : vector<8x128xf32>
    %28 = math.exp %27 : vector<8x128xf32>
    %cst_15 = arith.constant dense<0.000000e+00> : vector<128xf32>
    %29 = vector.multi_reduction <add>, %28, %cst_15 [0] : vector<8x128xf32> to vector<128xf32>
    %30 = vector.shape_cast %29 : vector<128xf32> to vector<1x128xf32>
    %31 = vector.shape_cast %25 : vector<1x128xf32> to vector<1x1x128xf32>
    %32 = vector.shape_cast %31 : vector<1x1x128xf32> to vector<1x1x128xf32>
    %33 = vector.broadcast %32 : vector<1x1x128xf32> to vector<1x8x128xf32>
    %c0_16 = arith.constant 0 : index
    %c0_17 = arith.constant 0 : index
    %c0_18 = arith.constant 0 : index
    %34 = vector.load %arg7[%c0_16, %c0_17, %c0_18] : memref<1x8x128xf32, #tpu.memory_space<vmem>>, vector<1x8x128xf32>
    tpu.vector_store %arg7[%c0_16, %c0_17, %c0_18], %33 {strides = array<i32>} : memref<1x8x128xf32, #tpu.memory_space<vmem>>, vector<1x8x128xf32>,
    %35 = vector.shape_cast %30 : vector<1x128xf32> to vector<1x1x128xf32>
    %36 = vector.shape_cast %35 : vector<1x1x128xf32> to vector<1x1x128xf32>
    %37 = vector.broadcast %36 : vector<1x1x128xf32> to vector<1x8x128xf32>
    %c0_19 = arith.constant 0 : index
    %c0_20 = arith.constant 0 : index
    %c0_21 = arith.constant 0 : index
    %38 = vector.load %arg8[%c0_19, %c0_20, %c0_21] : memref<1x8x128xf32, #tpu.memory_space<vmem>>, vector<1x8x128xf32>
    tpu.vector_store %arg8[%c0_19, %c0_20, %c0_21], %37 {strides = array<i32>} : memref<1x8x128xf32, #tpu.memory_space<vmem>>, vector<1x8x128xf32>,
    return
  }
  func.func @transform_0(%arg0: i32) -> (i32, i32) {
    %c0_i32 = arith.constant 0 : i32
    %c0_i32_0 = arith.constant 0 : i32
    return %arg0, %c0_i32 : i32, i32
  }
  func.func @transform_1(%arg0: i32) -> (i32, i32) {
    %c0_i32 = arith.constant 0 : i32
    %c0_i32_0 = arith.constant 0 : i32
    %c0_i32_1 = arith.constant 0 : i32
    return %c0_i32, %c0_i32_0 : i32, i32
  }
  func.func @transform_2(%arg0: i32) -> (i32, i32) {
    %c0_i32 = arith.constant 0 : i32
    %c0_i32_0 = arith.constant 0 : i32
    %c0_i32_1 = arith.constant 0 : i32
    return %c0_i32, %c0_i32_0 : i32, i32
  }
  func.func @transform_3(%arg0: i32) -> (i32, i32) {
    %c0_i32 = arith.constant 0 : i32
    %c0_i32_0 = arith.constant 0 : i32
    %c0_i32_1 = arith.constant 0 : i32
    return %c0_i32, %c0_i32_0 : i32, i32
  }
  func.func @transform_4(%arg0: i32) -> (i32, i32) {
    %c0_i32 = arith.constant 0 : i32
    %c0_i32_0 = arith.constant 0 : i32
    %c0_i32_1 = arith.constant 0 : i32
    return %c0_i32, %c0_i32_0 : i32, i32
  }
  func.func @transform_5(%arg0: i32) -> (i32, i32) {
    %c0_i32 = arith.constant 0 : i32
    %c0_i32_0 = arith.constant 0 : i32
    return %arg0, %c0_i32 : i32, i32
  }
  func.func @transform_6(%arg0: i32) -> (i32, i32, i32) {
    %c0_i32 = arith.constant 0 : i32
    %c0_i32_0 = arith.constant 0 : i32
    %c0_i32_1 = arith.constant 0 : i32
    return %arg0, %c0_i32, %c0_i32_0 : i32, i32, i32
  }
  func.func @transform_7(%arg0: i32) -> (i32, i32, i32) {
    %c0_i32 = arith.constant 0 : i32
    %c0_i32_0 = arith.constant 0 : i32
    %c0_i32_1 = arith.constant 0 : i32
    return %arg0, %c0_i32, %c0_i32_0 : i32, i32, i32
  }
}

</mosaic_0001>

<bundles_post_ra>
// kernel: conv_net1_forward.3
= control target key start
LH: loop header
LB: loop body
LE: loop exit
PB: predicated region body
PF: predicated region fallthrough
CT: control target
= control target key end

     0   :  { %v22_v0 = vlaneseq  ;;  %s78_s1 = inlined_call_operand.vmem [shape: f32[1,8,128], index: 1, kind: input, shape index: {}]   ;;  %s79_s0 = inlined_call_operand.vmem [shape: f32[8,128], index: 0, kind: input, shape index: {}, may-alias: {0,3}]   ;;  %s80_s2 = inlined_call_operand.vmem [shape: f32[1,8,128], index: 2, kind: input, shape index: {}]   ;;  %s81_s3 = inlined_call_operand.vmem [shape: f32[8,128], index: 3, kind: output, shape index: {}, may-alias: {0,3}]  }
   0x1   :  { %v14_v1 = vld [vmem:[%s78_s1] sm:$0xff] }
   0x2   :  { %v16_v2 = vsub.f32 %v14_v1, %v14_v1  ;;  %v23_v3 = vshrl.u32 %v22_v0, 7  ;;  %v21_v7 = vld [vmem:[%s79_s0] sm:$0xff] }
   0x3   :  { %v15_v9 = vld [vmem:[%s80_s2] sm:$0xff] }
   0x4   :  { %v17_v4 = vmul.f32 1.442695, %v16_v2  ;;  %v24_v5 = vsub.s32 0, %v23_v3 }
   0x6   :  { %40 = vpow2.f32 %v17_v4  ;;  %v25_v6 = vrot.slane %v14_v1, %v24_v5 }
   0x8   :  { %v26_v8 = vsub.f32 %v21_v7, %v25_v6 }
   0xa   :  { %v27_v10 = vmul.f32 1.442695, %v26_v8 }
   0xc   :  { %42 = vpow2.f32 %v27_v10 }
  0x13   :  { %v41_v11 = vpop.eup %40 }
  0x14   :  { %v19_v12 = vmul.f32 %v41_v11, %v15_v9 }
  0x16   :  { %44 = vrcp.f32 %v19_v12 }
  0x19   :  { %v43_v13 = vpop.eup %42 }
  0x23   :  { %v45_v14 = vpop.eup %44 }
  0x24   :  { %v33_v15 = vrot.slane %v45_v14, %v24_v5 }
  0x26   :  { %v34_v16 = vmul.f32 %v43_v13, %v33_v15 }
  0x28   :  { %35 = vst [vmem:[%s81_s3] sm:$0xff] %v34_v16 }

// kernel: conv_net1_forward.2
= control target key start
LH: loop header
LB: loop body
LE: loop exit
PB: predicated region body
PF: predicated region fallthrough
CT: control target
= control target key end

     0   :  { %13 = vsyncpa [#allocation3], 0  ;;  %s563_s0 = inlined_call_operand.vmem [shape: f32[8,192], index: 0, kind: input, shape index: {}]   ;;  %s564_s1 = inlined_call_operand.hbm [shape: bf16[192,128], index: 1, kind: input, shape index: {}]   ;;  %s565_s2 = inlined_call_operand.vmem [shape: f32[1,128], index: 2, kind: input, shape index: {}]   ;;  %s566_s3 = inlined_call_operand.hbm [shape: bf16[128,128], index: 3, kind: input, shape index: {}]   ;;  %s567_s4 = inlined_call_operand.vmem [shape: f32[1,128], index: 4, kind: input, shape index: {}]   ;;  %s568_s5 = inlined_call_operand.vmem [shape: f32[8,128], index: 5, kind: output, shape index: {0}]   ;;  %s569_s6 = inlined_call_operand.vmem [shape: f32[1,8,128], index: 6, kind: output, shape index: {1}]   ;;  %s570_s7 = inlined_call_operand.vmem [shape: f32[1,8,128], index: 7, kind: output, shape index: {2}]  }
   0x1   :  { %14 = vsyncpa [#allocation5], 0  ;;  %s480_s24 = smov [#allocation2]  }
   0x2   :  { %s22_s25 = sshll.u32 %s480_s24, 4  ;;  %s23_s25 = int_to_ptr.vmem [resolvable:$true] %s22_s25 }
   0x3   :  { %s444_s26 = scalar_lea.vmem %s23_s25, 1536  ;;  %p449_p1 = scmp.lt.s32.totalorder %s23_s25, %s23_s25 }
   0x4   :  { %p445_p0 = scmp.ne.s32.totalorder %s23_s25, %s444_s26  ;;  %p450_p2 = scmp.lt.s32.totalorder %s444_s26, %s444_s26 }
   0x6   :  { %p451_p3 = por %p450_p2, %p449_p1 }
   0x8   :  { %p452_p4 = pnand %p451_p3, %p445_p0 }
   0xa   :  { %455 = shalt.err (!%p452_p4)
}
   0xb   :  { %s481_s27 = smov 64   ;;  %s482_s28 = smov 4  }
   0xc   :  { %28 = dma.hbm_to_vmem [thread:$0]  %s564_s1, 1536, %s23_s25, [#allocation3], %s481_s27, %s481_s27, %s482_s28  }
   0xd   :  { %s483_s8 = smov [#allocation4]  }
   0xe   :  { %s36_s9 = sshll.u32 %s483_s8, 4  ;;  %s37_s9 = int_to_ptr.vmem [resolvable:$true] %s36_s9 }
   0xf   :  { %s464_s10 = scalar_lea.vmem %s37_s9, 1024  ;;  %p469_p6 = scmp.lt.s32.totalorder %s37_s9, %s37_s9 }
  0x10   :  { %p465_p5 = scmp.ne.s32.totalorder %s37_s9, %s464_s10  ;;  %p470_p7 = scmp.lt.s32.totalorder %s464_s10, %s464_s10 }
  0x12   :  { %p471_p8 = por %p470_p7, %p469_p6 }
  0x14   :  { %p472_p9 = pnand %p471_p8, %p465_p5 }
  0x16   :  { %475 = shalt.err (!%p472_p9)
}
  0x17   :  { %42 = dma.hbm_to_vmem [thread:$0]  %s566_s3, 1024, %s37_s9, [#allocation5], %s481_s27, %s481_s27, %s482_s28  }
  0x18   :  { %476 = dma.done.wait [#allocation3], 1536  }
  0x19   :  { %477 = vsyncadd [#allocation3], 4294965760 }
  0x1a   :  { %478 = dma.done.wait [#allocation5], 1024  }
  0x1b   :  { %479 = vsyncadd [#allocation5], 4294966272  ;;  %v484_v0 = vmov 0   ;;  %v485_v1 = vmov 0.0   ;;  %v414_v2 = vld [vmem:[#allocation2 + $0x38] sm:$0xff]   ;;  %v415_v3 = vld [vmem:[#allocation2 + $0x30] sm:$0xff]   ;;  %v316_v34 = vlaneseq }
  0x1c   :  { %163 = vmatprep.subr.bf16.mxu0 %v484_v0  ;;  %387 = vmatprep.subr.bf16.mxu1 %v485_v1  ;;  %v416_v4 = vld [vmem:[#allocation2 + $0x28] sm:$0xff]   ;;  %v417_v5 = vld [vmem:[#allocation2 + $0x20] sm:$0xff]   ;;  %vm159_vm0 = vcmask 523264   ;;  %v426_v8 = vld [vmem:[#allocation4 + $0x38] sm:$0xff]   ;;  %vm486_vm1 = vmmov 0  }
  0x1d   :  { %164 = vmatpush1.bf16.msra.mxu0 %v414_v2  ;;  %v53_v6 = vld [vmem:[%s563_s0 + $0x8] sm:$0xff]  ;;  %v418_v9 = vld [vmem:[#allocation2 + $0x18] sm:$0xff]   ;;  %388 = vmatpush3.bf16.msra.mxu1 %v426_v8  ;;  %v427_v10 = vld [vmem:[#allocation4 + $0x30] sm:$0xff]   ;;  %v317_v35 = vshrl.u32 %v316_v34, 7 }
  0x1e   :  { %165 = vmatprep.subr.bf16.mxu0 %v484_v0  ;;  %v55_v7 = vpack.c.bf16 %v53_v6, %v53_v6  ;;  %389 = vmatprep.subr.bf16.mxu1 %v485_v1  ;;  %v419_v11 = vld [vmem:[#allocation2 + $0x10] sm:$0xff]   ;;  %v428_v12 = vld [vmem:[#allocation4 + $0x28] sm:$0xff]   ;;  %v429_v14 = vld [vmem:[#allocation4 + $0x20] sm:$0xff]  }
  0x1f   :  { %v420_v13 = vld [vmem:[#allocation2 + $0x8] sm:$0xff]   ;;  %v421_v15 = vld [vmem:[#allocation2] sm:$0xff]   ;;  %v430_v16 = vld [vmem:[#allocation4 + $0x18] sm:$0xff]   ;;  %403 = vmatprep.mubr.msk.bf16.mxu1 %vm486_vm1, %v485_v1  ;;  %vm321_vm2 = vcmp.lt.s32.totalorder %v317_v35, 2 }
  0x20   :  { %368 = vmatprep.mubr.msk.bf16.mxu0 %vm159_vm0, %v55_v7  ;;  %v422_v17 = vld [vmem:[#allocation2 + $0x58] sm:$0xff]   ;;  %v431_v18 = vld [vmem:[#allocation4 + $0x10] sm:$0xff]   ;;  %v424_v20 = vld [vmem:[#allocation2 + $0x48] sm:$0xff]  }
  0x21   :  { %166 = vmatpush1.bf16.msra.mxu0 %v415_v3  ;;  %390 = vmatpush3.bf16.msra.mxu1 %v427_v10  ;;  %v423_v19 = vld [vmem:[#allocation2 + $0x50] sm:$0xff]   ;;  %v425_v21 = vld [vmem:[#allocation2 + $0x40] sm:$0xff]   ;;  %v432_v24 = vld [vmem:[#allocation4 + $0x8] sm:$0xff]  }
  0x22   :  { %167 = vmatprep.subr.bf16.mxu0 %v484_v0  ;;  %391 = vmatprep.subr.bf16.mxu1 %v485_v1  ;;  %v52_v22 = vld [vmem:[%s563_s0] sm:$0xff] }
  0x23   :  { %v54_v23 = vpack.c.bf16 %v52_v22, %v52_v22  ;;  %v433_v25 = vld [vmem:[#allocation4] sm:$0xff]  }
  0x24   :  { %v355_v26 = vld [vmem:[%s565_s2] ss:$0 sm:$0xff] }
  0x25   :  { %168 = vmatpush1.bf16.msra.mxu0 %v416_v4  ;;  %392 = vmatpush3.bf16.msra.mxu1 %v428_v12  ;;  %v369_v36 = vld [vmem:[%s567_s4] ss:$0 sm:$0xff] }
  0x26   :  { %169 = vmatprep.subr.bf16.mxu0 %v484_v0  ;;  %393 = vmatprep.subr.bf16.mxu1 %v485_v1 }
  0x29   :  { %170 = vmatpush1.bf16.msra.mxu0 %v417_v5  ;;  %394 = vmatpush3.bf16.msra.mxu1 %v429_v14 }
  0x2a   :  { %171 = vmatprep.subr.bf16.mxu0 %v484_v0  ;;  %395 = vmatprep.subr.bf16.mxu1 %v485_v1 }
  0x2d   :  { %172 = vmatpush1.bf16.msra.mxu0 %v418_v9  ;;  %396 = vmatpush3.bf16.msra.mxu1 %v430_v16 }
  0x2e   :  { %173 = vmatprep.subr.bf16.mxu0 %v484_v0  ;;  %397 = vmatprep.subr.bf16.mxu1 %v485_v1 }
  0x31   :  { %174 = vmatpush1.bf16.msra.mxu0 %v419_v11  ;;  %398 = vmatpush3.bf16.msra.mxu1 %v431_v18 }
  0x32   :  { %175 = vmatprep.subr.bf16.mxu0 %v484_v0  ;;  %399 = vmatprep.subr.bf16.mxu1 %v485_v1 }
  0x35   :  { %176 = vmatpush1.bf16.msra.mxu0 %v420_v13  ;;  %400 = vmatpush3.bf16.msra.mxu1 %v432_v24 }
  0x36   :  { %177 = vmatprep.subr.bf16.mxu0 %v484_v0  ;;  %401 = vmatprep.subr.bf16.mxu1 %v485_v1 }
  0x39   :  { %178 = vmatpush1.bf16.msra.mxu0 %v421_v15  ;;  %402 = vmatpush3.bf16.msra.mxu1 %v433_v25 }
  0x3a   :  { %187 = vmatprep.subr.bf16.mxu0 %v484_v0 }
  0x3d   :  { %188 = vmatpush2.bf16.msra.mxu0 %v422_v17 }
  0x3e   :  { %189 = vmatprep.subr.bf16.mxu0 %v484_v0 }
  0x41   :  { %190 = vmatpush2.bf16.msra.mxu0 %v423_v19 }
  0x42   :  { %191 = vmatprep.subr.bf16.mxu0 %v484_v0 }
  0x45   :  { %192 = vmatpush2.bf16.msra.mxu0 %v424_v20 }
  0x46   :  { %193 = vmatprep.subr.bf16.mxu0 %v484_v0 }
  0x49   :  { %194 = vmatpush2.bf16.msra.mxu0 %v425_v21 }
  0x4c   :  { %196 = vmatmul.mubr.bf16.vlgmr.msra.gmra.mxu0 %v54_v23 }
 0x10c   :  { %v197_v27 = vpop.f32.mrf.mxu0 }
 0x10d   :  { %v198_v28 = vadd.f32 %v355_v26, %v197_v27 }
 0x10e   :  { %v199_v29 = vpop.f32.mrf.mxu0 }
 0x10f   :  { %v203_v30 = vmax.f32 %v198_v28, 0.0 }
 0x110   :  { %v200_v31 = vpop.f32.mrf.mxu0 }
 0x111   :  { %v204_v32 = vpack.c.bf16 %v203_v30, %v203_v30 }
 0x112   :  { %v201_v33 = vpop.f32.mrf.mxu0 }
 0x113   :  { %404 = vmatmul.mubr.bf16.vlgmr.msra.gmra.mxu1 %v204_v32 }
 0x1d3   :  { %v310_v37 = vpop.f32.mrf.mxu1 }
 0x1d4   :  { %v311_v38 = vadd.f32 %v369_v36, %v310_v37 }
 0x1d5   :  { %v405_v39 = vpop.f32.mrf.mxu1 }
 0x1d6   :  { %v322_v40 = vsel %vm321_vm2, %v311_v38, -1e+30 }
 0x1d7   :  { %323 = vst [vmem:[%s568_s5] sm:$0xff] %v322_v40  ;;  %v324_v41 = vrot.slane %v322_v40, 4  ;;  %v313_v42 = vpop.f32.mrf.mxu1 }
 0x1d9   :  { %v325_v43 = vmax.f32 %v322_v40, %v324_v41  ;;  %v406_v44 = vpop.f32.mrf.mxu1 }
 0x1db   :  { %v326_v45 = vrot.slane %v325_v43, 2 }
 0x1dd   :  { %v327_v46 = vmax.f32 %v325_v43, %v326_v45 }
 0x1df   :  { %v328_v47 = vrot.slane %v327_v46, 1 }
 0x1e1   :  { %v329_v48 = vmax.f32 %v327_v46, %v328_v47 }
 0x1e3   :  { %v330_v49 = vsub.f32 %v322_v40, %v329_v48  ;;  %339 = vst [vmem:[%s569_s6] sm:$0xff] %v329_v48 }
 0x1e5   :  { %v331_v50 = vmul.f32 1.442695, %v330_v49 }
 0x1e7   :  { %434 = vpow2.f32 %v331_v50 }
 0x1f4   :  { %v435_v51 = vpop.eup %434 }
 0x1f5   :  { %v333_v52 = vrot.slane %v435_v51, 4 }
 0x1f7   :  { %v334_v53 = vadd.f32 %v435_v51, %v333_v52 }
 0x1f9   :  { %v335_v54 = vrot.slane %v334_v53, 2 }
 0x1fb   :  { %v336_v55 = vadd.f32 %v335_v54, %v334_v53 }
 0x1fd   :  { %v337_v56 = vrot.slane %v336_v55, 1 }
 0x1ff   :  { %v338_v57 = vadd.f32 %v337_v56, %v336_v55 }
 0x201   :  { %340 = vst [vmem:[%s570_s7] sm:$0xff] %v338_v57 }
 0x202   :  { %353 = vsyncpa [#allocation3], 1 }
 0x203   :  { %354 = vsyncpa [#allocation5], 1 }

</bundles_post_ra>
